<compile_context>
chip_gen: v7x
topology: tpu7x:2x2x1
jax: 0.10.0
libtpu: 0.0.40
codegen_flags: <defaults>
</compile_context>

<pallas_src>
import functools

import jax
import jax.numpy as jnp
from jax.experimental import pallas as pl
from jax.experimental.pallas import tpu as pltpu


# ----------------------------- Pallas kernel -----------------------------
def _pose_embedder_mlp_kernel(x_ref, w1_ref, b1_ref, w2_ref, b2_ref,
                              w3_ref, b3_ref, out_ref):
    """3-layer MLP (matmul + bias + ReLU) fused, one batch tile per grid step.

    Weights/biases are f32 and VMEM-resident across grid steps (constant
    index_maps); dots accumulate in f32 on the MXU.
    """
    x = x_ref[...]                                                      # (TB, 32) f32

    h = jnp.dot(x, w1_ref[...], preferred_element_type=jnp.float32)    # (TB, 64)
    h = jnp.maximum(h + b1_ref[...], 0.0)                              # bias + ReLU

    h = jnp.dot(h, w2_ref[...], preferred_element_type=jnp.float32)    # (TB, 64)
    h = jnp.maximum(h + b2_ref[...], 0.0)

    o = jnp.dot(h, w3_ref[...], preferred_element_type=jnp.float32)    # (TB, 1024)
    o = o + b3_ref[...]
    out_ref[...] = o.astype(out_ref.dtype)                             # lane-dense store


# ----------------------------- Helpers ------------------------------------
def _cdiv(a, b):
    return (a + b - 1) // b


def _round_up(n, m):
    return _cdiv(n, m) * m


def _select_tiling(batch, max_block_b, *, megacore_split_threshold=256):
    """Pick (tile_rows, padded_batch, num_tiles) minimizing padding waste.

    When the batch is large enough, the tile count is forced even so the
    "parallel" batch axis feeds both v7x TensorCores (no-op on v5e/v6e).
    """
    num_tiles = _cdiv(batch, max_block_b)
    if batch >= megacore_split_threshold:
        num_tiles = max(num_tiles, 2)
        if num_tiles % 2:
            num_tiles += 1
    tb = _round_up(_cdiv(batch, num_tiles), 8)
    padded_b = tb * num_tiles
    return tb, padded_b, num_tiles


# ----------------------------- Wrapper -------------------------------------
def pose_embedder_forward(x, params, num_channels, spatial_size, *,
                          max_block_b=2048, out_dtype=jnp.float32):
    """x: (B, in_features) float32. Returns (B, num_channels, S, S) `out_dtype`.

    `out_dtype=jnp.bfloat16` halves the dominant HBM-write traffic (~2x on the
    memory roofline) when the consumer tolerates bf16 feature maps.
    """
    (w1, b1), (w2, b2), (w3, b3) = params
    B, in_features = x.shape
    hid1 = w1.shape[1]
    hid2 = w2.shape[1]
    out_features = w3.shape[1]
    assert out_features == num_channels * spatial_size ** 2

    # Tiny-batch fast path: the module's typical inference shape is B=2, where
    # a custom call + pad/slice is pure overhead — let XLA fuse it.
    if B <= 8:
        h = jnp.maximum(x @ w1 + b1, 0.0)
        h = jnp.maximum(h @ w2 + b2, 0.0)
        o = (h @ w3 + b3).astype(out_dtype)
        return o.reshape(-1, num_channels, spatial_size, spatial_size)

    tb, padded_b, num_tiles = _select_tiling(B, max_block_b)
    if padded_b != B:
        x = jnp.pad(x, ((0, padded_b - B), (0, 0)))
    grid = (num_tiles,)

    out_itemsize = jnp.dtype(out_dtype).itemsize
    flops = 2 * padded_b * (in_features * hid1 + hid1 * hid2 + hid2 * out_features)
    bytes_accessed = (
        padded_b * in_features * x.dtype.itemsize
        + sum(int(a.size) * a.dtype.itemsize for a in (w1, b1, w2, b2, w3, b3))
        + padded_b * out_features * out_itemsize
    )

    flat = pl.pallas_call(
        _pose_embedder_mlp_kernel,
        out_shape=jax.ShapeDtypeStruct((padded_b, out_features), out_dtype),
        grid=grid,
        in_specs=[
            pl.BlockSpec((tb, in_features), lambda i: (i, 0)),   # x: streams per tile
            pl.BlockSpec(w1.shape, lambda i: (0, 0)),            # weights/biases: resident
            pl.BlockSpec(b1.shape, lambda i: (0, 0)),
            pl.BlockSpec(w2.shape, lambda i: (0, 0)),
            pl.BlockSpec(b2.shape, lambda i: (0, 0)),
            pl.BlockSpec(w3.shape, lambda i: (0, 0)),
            pl.BlockSpec(b3.shape, lambda i: (0, 0)),
        ],
        out_specs=pl.BlockSpec((tb, out_features), lambda i: (i, 0)),  # lane-dense 1024
        compiler_params=pltpu.CompilerParams(
            dimension_semantics=("parallel",),          # megacore on v7x
            vmem_limit_bytes=48 * 1024 * 1024,          # headroom, still < v7x 64 MiB
        ),
        cost_estimate=pl.CostEstimate(
            flops=flops, transcendentals=0, bytes_accessed=bytes_accessed),
    )(x, w1, b1, w2, b2, w3, b3)

    if padded_b != B:
        flat = flat[:B]
    # Equivalent of `pose_embeds.view(-1, C, S, S)` (row-major reshape).
    return flat.reshape(-1, num_channels, spatial_size, spatial_size)


# ----------------------------- Param init --------------------------------
def _init_linear(key, fan_in, fan_out):
    """Deterministic init mimicking torch.nn.Linear default (uniform +-1/sqrt(fan_in)).

    Weight stored as (fan_in, fan_out) f32 so the kernel computes
    x @ W + b == torch's x @ weight.T + bias.  Bias is (1, fan_out) f32.
    """
    kw, kb = jax.random.split(key)
    bound = 1.0 / jnp.sqrt(jnp.float32(fan_in))
    w = jax.random.uniform(kw, (fan_in, fan_out), jnp.float32, -bound, bound)
    b = jax.random.uniform(kb, (1, fan_out), jnp.float32, -bound, bound)
    return w, b


# ----------------------------- Reference ---------------------------------
def _reference_forward(x, params, num_channels, spatial_size):
    """Pure-JAX f32 reference (matches the original PyTorch module's math)."""
    (w1, b1), (w2, b2), (w3, b3) = params
    h = jnp.maximum(x @ w1 + b1, 0.0)
    h = jnp.maximum(h @ w2 + b2, 0.0)
    o = h @ w3 + b3
    return o.reshape(-1, num_channels, spatial_size, spatial_size)


if __name__ == "__main__":
    # Synthetic config
    B = 2
    PSE_IN_CHANNELS = 32
    PSE_NUM_CHANNELS = 64
    INF_MAX_CHANNELS = 4          # C
    INF_INPUT_TENSOR_SIZE = 16    # S
    OUT_FEATURES = INF_MAX_CHANNELS * INF_INPUT_TENSOR_SIZE ** 2  # 1024

    key = jax.random.PRNGKey(0)
    kx, k1, k2, k3, kx2, kx3 = jax.random.split(key, 6)

    params = (
        _init_linear(k1, PSE_IN_CHANNELS, PSE_NUM_CHANNELS),
        _init_linear(k2, PSE_NUM_CHANNELS, PSE_NUM_CHANNELS),
        _init_linear(k3, PSE_NUM_CHANNELS, OUT_FEATURES),
    )

    fwd = functools.partial(pose_embedder_forward,
                            num_channels=INF_MAX_CHANNELS,
                            spatial_size=INF_INPUT_TENSOR_SIZE)

    # --- Small-batch check (B=2, typical inference): tiny-batch fast path ---
    x = jax.random.normal(kx, (B, PSE_IN_CHANNELS), jnp.float32)
    out = jax.block_until_ready(fwd(x, params))
    ref = _reference_forward(x, params, INF_MAX_CHANNELS, INF_INPUT_TENSOR_SIZE)
    assert out.shape == (B, INF_MAX_CHANNELS, INF_INPUT_TENSOR_SIZE, INF_INPUT_TENSOR_SIZE)
    assert jnp.allclose(out, ref, atol=1e-4, rtol=1e-4), "mismatch vs. reference (B=2)"

    # --- Medium batch (single tile, Pallas path, minimal padding) ---
    B2 = 100  # below the megacore split threshold -> grid=(1,), tb=104
    x2 = jax.random.normal(kx2, (B2, PSE_IN_CHANNELS), jnp.float32)
    out2 = jax.block_until_ready(fwd(x2, params))
    ref2 = _reference_forward(x2, params, INF_MAX_CHANNELS, INF_INPUT_TENSOR_SIZE)
    assert out2.shape == (B2, INF_MAX_CHANNELS, INF_INPUT_TENSOR_SIZE, INF_INPUT_TENSOR_SIZE)
    assert jnp.allclose(out2, ref2, atol=1e-4, rtol=1e-4), "mismatch vs. reference (B=100)"

    # --- Larger batch: even tile count (2 tiles of 304 rows, pads 600 -> 608) ---
    B3 = 600
    x3 = jax.random.normal(kx3, (B3, PSE_IN_CHANNELS), jnp.float32)
    out3 = jax.block_until_ready(fwd(x3, params))
    ref3 = _reference_forward(x3, params, INF_MAX_CHANNELS, INF_INPUT_TENSOR_SIZE)
    assert out3.shape == (B3, INF_MAX_CHANNELS, INF_INPUT_TENSOR_SIZE, INF_INPUT_TENSOR_SIZE)
    assert jnp.allclose(out3, ref3, atol=1e-4, rtol=1e-4), "mismatch vs. reference (B=600)"

    # --- Optional bf16-output path (biggest bandwidth lever if downstream allows) ---
    out3_bf16 = jax.block_until_ready(fwd(x3, params, out_dtype=jnp.bfloat16))
    assert out3_bf16.dtype == jnp.bfloat16
    assert jnp.allclose(out3_bf16.astype(jnp.float32), ref3, atol=3e-2, rtol=3e-2), \
        "mismatch vs. reference (B=600, bf16 out)"

    print("KERNEL_OK")
</pallas_src>

<mosaic_0001>
module attributes {stable_mosaic.version = 11 : i64} {
  func.func @_pose_embedder_mlp_kernel(%arg0: i32, %arg1: memref<104x32xf32, #tpu.memory_space<vmem>>, %arg2: memref<32x64xf32, #tpu.memory_space<vmem>>, %arg3: memref<1x64xf32, #tpu.memory_space<vmem>>, %arg4: memref<64x64xf32, #tpu.memory_space<vmem>>, %arg5: memref<1x64xf32, #tpu.memory_space<vmem>>, %arg6: memref<64x1024xf32, #tpu.memory_space<vmem>>, %arg7: memref<1x1024xf32, #tpu.memory_space<vmem>>, %arg8: memref<104x1024xf32, #tpu.memory_space<vmem>>) attributes {dimension_semantics = [#tpu.dimension_semantics<parallel>], iteration_bounds = array<i64: 1>, scalar_prefetch = 0 : i64, scratch_operands = 0 : i64, tpu.core_type = #tpu.core_type<tc>, window_params = [{transform_indices = @transform_0, window_bounds = array<i64: 104, 32>}, {pipeline_mode = #tpu.pipeline_mode<synchronous>, transform_indices = @transform_1, window_bounds = array<i64: 32, 64>}, {pipeline_mode = #tpu.pipeline_mode<synchronous>, transform_indices = @transform_2, window_bounds = array<i64: 1, 64>}, {pipeline_mode = #tpu.pipeline_mode<synchronous>, transform_indices = @transform_3, window_bounds = array<i64: 64, 64>}, {pipeline_mode = #tpu.pipeline_mode<synchronous>, transform_indices = @transform_4, window_bounds = array<i64: 1, 64>}, {pipeline_mode = #tpu.pipeline_mode<synchronous>, transform_indices = @transform_5, window_bounds = array<i64: 64, 1024>}, {pipeline_mode = #tpu.pipeline_mode<synchronous>, transform_indices = @transform_6, window_bounds = array<i64: 1, 1024>}, {transform_indices = @transform_7, window_bounds = array<i64: 104, 1024>}]} {
    %c0 = arith.constant 0 : index
    %c0_0 = arith.constant 0 : index
    %0 = vector.load %arg1[%c0, %c0_0] : memref<104x32xf32, #tpu.memory_space<vmem>>, vector<104x32xf32>
    %c0_1 = arith.constant 0 : index
    %c0_2 = arith.constant 0 : index
    %1 = vector.load %arg2[%c0_1, %c0_2] : memref<32x64xf32, #tpu.memory_space<vmem>>, vector<32x64xf32>
    %cst = arith.constant dense<0.000000e+00> : vector<104x64xf32>
    %2 = tpu.matmul %0, %1, %cst {dimension_numbers = #tpu.dot_dimension_numbers<[1], [0], [0], [1], [0, 0, 1, 1], [], []>} : vector<104x32xf32>, vector<32x64xf32>, vector<104x64xf32> -> vector<104x64xf32>
    %c0_3 = arith.constant 0 : index
    %c0_4 = arith.constant 0 : index
    %3 = vector.load %arg3[%c0_3, %c0_4] : memref<1x64xf32, #tpu.memory_space<vmem>>, vector<1x64xf32>
    %4 = vector.broadcast %3 : vector<1x64xf32> to vector<104x64xf32>
    %5 = arith.addf %2, %4 : vector<104x64xf32>
    %cst_5 = arith.constant 0.000000e+00 : f32
    %6 = vector.broadcast %cst_5 : f32 to vector<104x64xf32>
    %7 = arith.maximumf %5, %6 : vector<104x64xf32>
    %c0_6 = arith.constant 0 : index
    %c0_7 = arith.constant 0 : index
    %8 = vector.load %arg4[%c0_6, %c0_7] : memref<64x64xf32, #tpu.memory_space<vmem>>, vector<64x64xf32>
    %cst_8 = arith.constant dense<0.000000e+00> : vector<104x64xf32>
    %9 = tpu.matmul %7, %8, %cst_8 {dimension_numbers = #tpu.dot_dimension_numbers<[1], [0], [0], [1], [0, 0, 1, 1], [], []>} : vector<104x64xf32>, vector<64x64xf32>, vector<104x64xf32> -> vector<104x64xf32>
    %c0_9 = arith.constant 0 : index
    %c0_10 = arith.constant 0 : index
    %10 = vector.load %arg5[%c0_9, %c0_10] : memref<1x64xf32, #tpu.memory_space<vmem>>, vector<1x64xf32>
    %11 = vector.broadcast %10 : vector<1x64xf32> to vector<104x64xf32>
    %12 = arith.addf %9, %11 : vector<104x64xf32>
    %cst_11 = arith.constant 0.000000e+00 : f32
    %13 = vector.broadcast %cst_11 : f32 to vector<104x64xf32>
    %14 = arith.maximumf %12, %13 : vector<104x64xf32>
    %c0_12 = arith.constant 0 : index
    %c0_13 = arith.constant 0 : index
    %15 = vector.load %arg6[%c0_12, %c0_13] : memref<64x1024xf32, #tpu.memory_space<vmem>>, vector<64x1024xf32>
    %cst_14 = arith.constant dense<0.000000e+00> : vector<104x1024xf32>
    %16 = tpu.matmul %14, %15, %cst_14 {dimension_numbers = #tpu.dot_dimension_numbers<[1], [0], [0], [1], [0, 0, 1, 1], [], []>} : vector<104x64xf32>, vector<64x1024xf32>, vector<104x1024xf32> -> vector<104x1024xf32>
    %c0_15 = arith.constant 0 : index
    %c0_16 = arith.constant 0 : index
    %17 = vector.load %arg7[%c0_15, %c0_16] : memref<1x1024xf32, #tpu.memory_space<vmem>>, vector<1x1024xf32>
    %18 = vector.broadcast %17 : vector<1x1024xf32> to vector<104x1024xf32>
    %19 = arith.addf %16, %18 : vector<104x1024xf32>
    %c0_17 = arith.constant 0 : index
    %c0_18 = arith.constant 0 : index
    %20 = vector.load %arg8[%c0_17, %c0_18] : memref<104x1024xf32, #tpu.memory_space<vmem>>, vector<104x1024xf32>
    tpu.vector_store %arg8[%c0_17, %c0_18], %19 {strides = array<i32>} : memref<104x1024xf32, #tpu.memory_space<vmem>>, vector<104x1024xf32>,
    return
  }
  func.func @transform_0(%arg0: i32) -> (i32, i32) {
    %c0_i32 = arith.constant 0 : i32
    %c0_i32_0 = arith.constant 0 : i32
    return %arg0, %c0_i32 : i32, i32
  }
  func.func @transform_1(%arg0: i32) -> (i32, i32) {
    %c0_i32 = arith.constant 0 : i32
    %c0_i32_0 = arith.constant 0 : i32
    %c0_i32_1 = arith.constant 0 : i32
    return %c0_i32, %c0_i32_0 : i32, i32
  }
  func.func @transform_2(%arg0: i32) -> (i32, i32) {
    %c0_i32 = arith.constant 0 : i32
    %c0_i32_0 = arith.constant 0 : i32
    %c0_i32_1 = arith.constant 0 : i32
    return %c0_i32, %c0_i32_0 : i32, i32
  }
  func.func @transform_3(%arg0: i32) -> (i32, i32) {
    %c0_i32 = arith.constant 0 : i32
    %c0_i32_0 = arith.constant 0 : i32
    %c0_i32_1 = arith.constant 0 : i32
    return %c0_i32, %c0_i32_0 : i32, i32
  }
  func.func @transform_4(%arg0: i32) -> (i32, i32) {
    %c0_i32 = arith.constant 0 : i32
    %c0_i32_0 = arith.constant 0 : i32
    %c0_i32_1 = arith.constant 0 : i32
    return %c0_i32, %c0_i32_0 : i32, i32
  }
  func.func @transform_5(%arg0: i32) -> (i32, i32) {
    %c0_i32 = arith.constant 0 : i32
    %c0_i32_0 = arith.constant 0 : i32
    %c0_i32_1 = arith.constant 0 : i32
    return %c0_i32, %c0_i32_0 : i32, i32
  }
  func.func @transform_6(%arg0: i32) -> (i32, i32) {
    %c0_i32 = arith.constant 0 : i32
    %c0_i32_0 = arith.constant 0 : i32
    %c0_i32_1 = arith.constant 0 : i32
    return %c0_i32, %c0_i32_0 : i32, i32
  }
  func.func @transform_7(%arg0: i32) -> (i32, i32) {
    %c0_i32 = arith.constant 0 : i32
    %c0_i32_0 = arith.constant 0 : i32
    return %arg0, %c0_i32 : i32, i32
  }
}

</mosaic_0001>

<bundles_post_ra>
// kernel: tpu_custom_call.1
= control target key start
LH: loop header
LB: loop body
LE: loop exit
PB: predicated region body
PF: predicated region fallthrough
CT: control target
= control target key end

     0   :  { %12 = vsyncpa [#allocation3], 0  ;;  %s2266_s0 = inlined_call_operand.vmem [shape: f32[104,32], index: 0, kind: input, shape index: {}]   ;;  %s2267_s1 = inlined_call_operand.vmem [shape: f32[32,64], index: 1, kind: input, shape index: {}]   ;;  %s2268_s2 = inlined_call_operand.vmem [shape: f32[1,64], index: 2, kind: input, shape index: {}]   ;;  %s2269_s3 = inlined_call_operand.vmem [shape: f32[64,64], index: 3, kind: input, shape index: {}]   ;;  %s2270_s4 = inlined_call_operand.vmem [shape: f32[1,64], index: 4, kind: input, shape index: {}]   ;;  %s2271_s5 = inlined_call_operand.hbm [shape: f32[64,1024], index: 5, kind: input, shape index: {}]   ;;  %s2272_s6 = inlined_call_operand.vmem [shape: f32[1,1024], index: 6, kind: input, shape index: {}]   ;;  %s2273_s7 = inlined_call_operand.hbm [shape: f32[104,1024], index: 7, kind: output, shape index: {}]  }
   0x1   :  { %13 = vsyncpa [#allocation4], 0  ;;  %s1649_s24 = smov [#allocation2]   ;;  %s1601_s28 = scalar_lea.hbm %s2271_s5, 8192 }
   0x2   :  { %s29_s25 = sshll.u32 %s1649_s24, 4  ;;  %p1602_p0 = scmp.ne.s32.totalorder %s2271_s5, %s1601_s28  ;;  %s30_s25 = int_to_ptr.vmem [resolvable:$true] %s29_s25 }
   0x3   :  { %p1605_p1 = scmp.lt.u32.totalorder %s1601_s28, %s2271_s5 }
   0x5   :  { %p1607_p2 = pnand %p1605_p1, %p1602_p0 }
   0x7   :  { %1610 = shalt.err (!%p1607_p2)
}
   0x8   :  { %s1611_s10 = scalar_lea.vmem %s30_s25, 8192  ;;  %p1616_p4 = scmp.lt.s32.totalorder %s30_s25, %s30_s25 }
   0x9   :  { %p1612_p3 = scmp.ne.s32.totalorder %s30_s25, %s1611_s10  ;;  %p1617_p5 = scmp.lt.s32.totalorder %s1611_s10, %s1611_s10 }
   0xb   :  { %p1618_p6 = por %p1617_p5, %p1616_p4 }
   0xd   :  { %p1619_p7 = pnand %p1618_p6, %p1612_p3 }
   0xf   :  { %1622 = shalt.err (!%p1619_p7)
}
  0x10   :  { %s1650_s11 = smov 1024   ;;  %s1651_s12 = smov 64  }
  0x11   :  { %35 = dma.hbm_to_vmem [thread:$0]  %s2271_s5, 8192, %s30_s25, [#allocation3], %s1650_s11, %s1650_s11, %s1651_s12  }
  0x12   :  { %1645 = dma.done.wait [#allocation3], 8192  }
  0x13   :  { %1646 = vsyncadd [#allocation3], 4294959104  ;;  %v1652_v0 = vmov 0.0|0.0   ;;  %vm1653_vm0 = vmmov 0   ;;  %v1654_v1 = vmov 0.0   ;;  %v54_v2 = vld [vmem:[%s2267_s1] sm:$0xff] }
  0x14   :  { %1504 = vmatprep.subr.bf16.mxu0 %v1652_v0  ;;  %1410 = vmatprep.mubr.msk.f32.mxu0 %vm1653_vm0, %v1654_v1  ;;  %v55_v3 = vld [vmem:[%s2267_s1 + $0x8] sm:$0xff]  ;;  %v56_v4 = vld [vmem:[%s2267_s1 + $0x10] sm:$0xff]  ;;  %v57_v6 = vld [vmem:[%s2267_s1 + $0x18] sm:$0xff]  ;;  %vm65_vm1 = vcmask 261120   ;;  %vm263_vm2 = vcmask 523264  }
  0x15   :  { %1510 = vmatprep.subr.bf16.mxu1 %v1652_v0  ;;  %1465 = vmatprep.mubr.msk.f32.mxu1 %vm1653_vm0, %v1654_v1  ;;  %v1505_v5 = vpack.c.bf16 %v55_v3, %v54_v2  ;;  %v1508_v7 = vpack.c.bf16 %v57_v6, %v56_v4  ;;  %v248_v8 = vld [vmem:[%s2269_s3] sm:$0xff]  ;;  %v249_v9 = vld [vmem:[%s2269_s3 + $0x8] sm:$0xff]  ;;  %v250_v10 = vld [vmem:[%s2269_s3 + $0x10] sm:$0xff] }
  0x16   :  { %v251_v11 = vld [vmem:[%s2269_s3 + $0x18] sm:$0xff]  ;;  %v41_v12 = vld [vmem:[%s2266_s0] sm:$0xff]  ;;  %v1511_v13 = vpack.c.bf16 %v249_v9, %v248_v8  ;;  %v253_v16 = vld [vmem:[%s2269_s3 + $0x28] sm:$0xff] }
  0x17   :  { %1506 = vmatpush3.bf16.msra.mxu0 %v1505_v5  ;;  %v1514_v14 = vpack.c.bf16 %v251_v11, %v250_v10  ;;  %v252_v15 = vld [vmem:[%s2269_s3 + $0x20] sm:$0xff]  ;;  %v42_v17 = vld [vmem:[%s2266_s0 + $0x8] sm:$0xff]  ;;  %v43_v19 = vld [vmem:[%s2266_s0 + $0x10] sm:$0xff] }
  0x18   :  { %1507 = vmatprep.subr.bf16.mxu0 %v1652_v0  ;;  %1512 = vmatpush3.bf16.msra.mxu1 %v1511_v13  ;;  %v1517_v18 = vpack.c.bf16 %v253_v16, %v252_v15  ;;  %v44_v20 = vld [vmem:[%s2266_s0 + $0x18] sm:$0xff]  ;;  %v45_v21 = vld [vmem:[%s2266_s0 + $0x20] sm:$0xff]  ;;  %v46_v22 = vld [vmem:[%s2266_s0 + $0x28] sm:$0xff] }
  0x19   :  { %1513 = vmatprep.subr.bf16.mxu1 %v1652_v0  ;;  %v47_v23 = vld [vmem:[%s2266_s0 + $0x30] sm:$0xff]  ;;  %v48_v24 = vld [vmem:[%s2266_s0 + $0x38] sm:$0xff]  ;;  %v49_v25 = vld [vmem:[%s2266_s0 + $0x40] sm:$0xff] }
  0x1a   :  { %v50_v26 = vld [vmem:[%s2266_s0 + $0x48] sm:$0xff]  ;;  %v51_v27 = vld [vmem:[%s2266_s0 + $0x50] sm:$0xff]  ;;  %v52_v28 = vld [vmem:[%s2266_s0 + $0x58] sm:$0xff] }
  0x1b   :  { %1509 = vmatpush3.bf16.msra.mxu0 %v1508_v7  ;;  %v53_v29 = vld [vmem:[%s2266_s0 + $0x60] sm:$0xff]  ;;  %v254_v30 = vld [vmem:[%s2269_s3 + $0x30] sm:$0xff]  ;;  %v255_v31 = vld [vmem:[%s2269_s3 + $0x38] sm:$0xff] }
  0x1c   :  { %1515 = vmatpush3.bf16.msra.mxu1 %v1514_v14  ;;  %v1520_v32 = vpack.c.bf16 %v255_v31, %v254_v30  ;;  %v447_v33 = vld [vmem:[#allocation2 + $0x8] sm:$0xff]  ;;  %v446_v35 = vld [vmem:[#allocation2] sm:$0xff]  ;;  %v449_v38 = vld [vmem:[#allocation2 + $0x18] sm:$0xff] }
  0x1d   :  { %1516 = vmatprep.subr.bf16.mxu1 %v1652_v0  ;;  %v455_v34 = vld [vmem:[#allocation2 + $0x48] sm:$0xff]  ;;  %v454_v37 = vld [vmem:[#allocation2 + $0x40] sm:$0xff]  ;;  %v457_v39 = vld [vmem:[#allocation2 + $0x58] sm:$0xff] }
  0x1e   :  { %1411 = vmatmul.mubr.msk.f32.vlgmr.msra.gmra.mrb[0].mxu0 %vm65_vm1, %v41_v12  ;;  %v1522_v36 = vpack.c.bf16 %v455_v34, %v447_v33  ;;  %v1524_v40 = vpack.c.bf16 %v454_v37, %v446_v35  ;;  %v1538_v41 = vpack.c.bf16 %v457_v39, %v449_v38  ;;  %v463_v42 = vld [vmem:[#allocation2 + $0x88] sm:$0xff]  ;;  %v462_v44 = vld [vmem:[#allocation2 + $0x80] sm:$0xff]  ;;  %v448_v61 = vld [vmem:[#allocation2 + $0x10] sm:$0xff] }
  0x1f   :  { %1413 = vmatprep.mubr.msk.f32.mxu0 %vm1653_vm0, %v1654_v1  ;;  %v471_v43 = vld [vmem:[#allocation2 + $0xc8] sm:$0xff]  ;;  %v470_v45 = vld [vmem:[#allocation2 + $0xc0] sm:$0xff]  ;;  %v456_v62 = vld [vmem:[#allocation2 + $0x50] sm:$0xff] }
  0x20   :  { %1518 = vmatpush3.bf16.msra.mxu1 %v1517_v18  ;;  %1523 = vmatprep.subr.bf16.mxu0 %v1522_v36  ;;  %v1526_v46 = vpack.c.bf16 %v471_v43, %v463_v42  ;;  %v1528_v47 = vpack.c.bf16 %v470_v45, %v462_v44  ;;  %v479_v48 = vld [vmem:[#allocation2 + $0x108] sm:$0xff]  ;;  %v478_v51 = vld [vmem:[#allocation2 + $0x100] sm:$0xff]  ;;  %v473_v2 = vld [vmem:[#allocation2 + $0xd8] sm:$0xff]  ;;  %v1540_v5 = vpack.c.bf16 %v456_v62, %v448_v61 }
  0x21   :  { %1519 = vmatprep.subr.bf16.mxu1 %v1652_v0  ;;  %1525 = vmatpush1.bf16.msra.mxu0 %v1524_v40  ;;  %v487_v49 = vld [vmem:[#allocation2 + $0x148] sm:$0xff]  ;;  %v486_v52 = vld [vmem:[#allocation2 + $0x140] sm:$0xff]  ;;  %v465_v0 = vld [vmem:[#allocation2 + $0x98] sm:$0xff] }
  0x22   :  { %1414 = vmatmul.mubr.msk.f32.gmra.mrb[2].mxu0 %vm65_vm1, %v42_v17  ;;  %1527 = vmatprep.subr.bf16.mxu0 %v1526_v46  ;;  %v1530_v50 = vpack.c.bf16 %v487_v49, %v479_v48  ;;  %v1532_v53 = vpack.c.bf16 %v486_v52, %v478_v51  ;;  %v495_v54 = vld [vmem:[#allocation2 + $0x188] sm:$0xff]  ;;  %v494_v57 = vld [vmem:[#allocation2 + $0x180] sm:$0xff]  ;;  %v1542_v7 = vpack.c.bf16 %v473_v2, %v465_v0  ;;  %v464_v8 = vld [vmem:[#allocation2 + $0x90] sm:$0xff] }
  0x23   :  { %1416 = vmatprep.mubr.msk.f32.mxu0 %vm1653_vm0, %v1654_v1  ;;  %v503_v55 = vld [vmem:[#allocation2 + $0x1c8] sm:$0xff]  ;;  %v502_v58 = vld [vmem:[#allocation2 + $0x1c0] sm:$0xff]  ;;  %v472_v9 = vld [vmem:[#allocation2 + $0xd0] sm:$0xff] }
  0x24   :  { %1521 = vmatpush3.bf16.msra.mxu1 %v1520_v32  ;;  %v1534_v56 = vpack.c.bf16 %v503_v55, %v495_v54  ;;  %v1536_v59 = vpack.c.bf16 %v502_v58, %v494_v57  ;;  %v1831_v60 = vld [vmem:[%s2268_s2] ss:$0 sm:$0xff]  ;;  %v481_v11 = vld [vmem:[#allocation2 + $0x118] sm:$0xff]  ;;  %v1544_v15 = vpack.c.bf16 %v472_v9, %v464_v8  ;;  %v480_v18 = vld [vmem:[#allocation2 + $0x110] sm:$0xff] }
  0x25   :  { %1539 = vmatprep.subr.bf16.mxu1 %v1538_v41  ;;  %1529 = vmatpush1.bf16.msra.mxu0 %v1528_v47  ;;  %v489_v12 = vld [vmem:[#allocation2 + $0x158] sm:$0xff]  ;;  %v451_v9 = vld [vmem:[#allocation2 + $0x28] sm:$0xff] }
  0x26   :  { %1417 = vmatmul.mubr.msk.f32.gmra.mrb[4].mxu0 %vm65_vm1, %v43_v19  ;;  %1531 = vmatprep.subr.bf16.mxu0 %v1530_v50  ;;  %v1546_v17 = vpack.c.bf16 %v489_v12, %v481_v11  ;;  %v488_v19 = vld [vmem:[#allocation2 + $0x150] sm:$0xff]  ;;  %v461_v12 = vld [vmem:[#allocation2 + $0x78] sm:$0xff] }
  0x27   :  { %1419 = vmatprep.mubr.msk.f32.mxu0 %vm1653_vm0, %v1654_v1 }
  0x29   :  { %1533 = vmatpush1.bf16.msra.mxu0 %v1532_v53 }
  0x2a   :  { %1420 = vmatmul.mubr.msk.f32.gmra.mrb[6].mxu0 %vm65_vm1, %v44_v20  ;;  %1535 = vmatprep.subr.bf16.mxu0 %v1534_v56 }
  0x2b   :  { %1422 = vmatprep.mubr.msk.f32.mxu0 %vm1653_vm0, %v1654_v1 }
  0x2d   :  { %1537 = vmatpush1.bf16.msra.mxu0 %v1536_v59 }
  0x2e   :  { %1423 = vmatmul.mubr.msk.f32.gmra.mrb[8].mxu0 %vm65_vm1, %v45_v21  ;;  %v497_v21 = vld [vmem:[#allocation2 + $0x198] sm:$0xff] }
  0x2f   :  { %1425 = vmatprep.mubr.msk.f32.mxu0 %vm1653_vm0, %v1654_v1 }
  0x32   :  { %1426 = vmatmul.mubr.msk.f32.gmra.mrb[10].mxu0 %vm65_vm1, %v46_v22  ;;  %v505_v22 = vld [vmem:[#allocation2 + $0x1d8] sm:$0xff] }
  0x33   :  { %1428 = vmatprep.mubr.msk.f32.mxu0 %vm1653_vm0, %v1654_v1 }
  0x36   :  { %1429 = vmatmul.mubr.msk.f32.gmra.mrb[12].mxu0 %vm65_vm1, %v47_v23 }
  0x37   :  { %1431 = vmatprep.mubr.msk.f32.mxu0 %vm1653_vm0, %v1654_v1 }
  0x3a   :  { %1432 = vmatmul.mubr.msk.f32.gmra.mrb[14].mxu0 %vm65_vm1, %v48_v24 }
  0x3b   :  { %1434 = vmatprep.mubr.msk.f32.mxu0 %vm1653_vm0, %v1654_v1 }
  0x3e   :  { %1435 = vmatmul.mubr.msk.f32.gmra.mrb[16].mxu0 %vm65_vm1, %v49_v25  ;;  %v1548_v25 = vpack.c.bf16 %v488_v19, %v480_v18  ;;  %v452_v18 = vld [vmem:[#allocation2 + $0x30] sm:$0xff] }
  0x3f   :  { %1437 = vmatprep.mubr.msk.f32.mxu0 %vm1653_vm0, %v1654_v1  ;;  %v460_v19 = vld [vmem:[#allocation2 + $0x70] sm:$0xff] }
  0x42   :  { %1438 = vmatmul.mubr.msk.f32.gmra.mrb[18].mxu0 %vm65_vm1, %v50_v26 }
  0x43   :  { %1440 = vmatprep.mubr.msk.f32.mxu0 %vm1653_vm0, %v1654_v1 }
  0x46   :  { %1441 = vmatmul.mubr.msk.f32.gmra.mrb[20].mxu0 %vm65_vm1, %v51_v27  ;;  %v1550_v27 = vpack.c.bf16 %v505_v22, %v497_v21 }
  0x47   :  { %1443 = vmatprep.mubr.msk.f32.mxu0 %vm1653_vm0, %v1654_v1 }
  0x4a   :  { %1444 = vmatmul.mubr.msk.f32.gmra.mrb[22].mxu0 %vm65_vm1, %v52_v28 }
  0x4b   :  { %1446 = vmatprep.mubr.msk.f32.mxu0 %vm1653_vm0, %v1654_v1 }
  0x4e   :  { %1447 = vmatmul.mubr.msk.f32.gmra.mrb[24].mxu0 %vm65_vm1, %v53_v29 }
  0x4f   :  { %655 = vmatprep.mubr.f32.mxu0 %v1654_v1 }
  0xf1   :  { %v171_v63 = vpop.f32.mrb[0].mxu0 }
  0xf2   :  { %v172_v3 = vadd.f32 %v1831_v60, %v171_v63  ;;  %v1412_v4 = vpop.f32.mrb[1].mxu0 }
  0xf4   :  { %v235_v6 = vmax.f32 %v172_v3, 0.0 }
  0xf5   :  { %v176_v10 = vpop.f32.mrb[2].mxu0 }
  0xf6   :  { %v177_v13 = vadd.f32 %v1831_v60, %v176_v10  ;;  %v1415_v14 = vpop.f32.mrb[3].mxu0  ;;  %1466 = vmatmul.mubr.msk.f32.vlgmr.msra.gmra.mrb[0].mxu1 %vm263_vm2, %v235_v6  ;;  %v496_v6 = vld [vmem:[#allocation2 + $0x190] sm:$0xff]  ;;  %v459_v10 = vld [vmem:[#allocation2 + $0x68] sm:$0xff] }
  0xf7   :  { %1468 = vmatprep.mubr.msk.f32.mxu1 %vm1653_vm0, %v1654_v1  ;;  %1541 = vmatpush1.bf16.msra.mxu1 %v1540_v5  ;;  %v1554_v11 = vpack.c.bf16 %v459_v10, %v451_v9  ;;  %v1890_v14 = vld [vmem:[%s2270_s4] ss:$0 sm:$0xff] }
  0xf8   :  { %v236_v16 = vmax.f32 %v177_v13, 0.0  ;;  %1543 = vmatprep.subr.bf16.mxu1 %v1542_v7  ;;  %v504_v7 = vld [vmem:[#allocation2 + $0x1d0] sm:$0xff] }
  0xf9   :  { %v181_v20 = vpop.f32.mrb[4].mxu0  ;;  %v1552_v8 = vpack.c.bf16 %v504_v7, %v496_v6  ;;  %1555 = vmatprep.subr.bf16.mxu0 %v1554_v11 }
  0xfa   :  { %v182_v23 = vadd.f32 %v1831_v60, %v181_v20  ;;  %v1418_v24 = vpop.f32.mrb[5].mxu0  ;;  %1469 = vmatmul.mubr.msk.f32.gmra.mrb[2].mxu1 %vm263_vm2, %v236_v16  ;;  %v458_v16 = vld [vmem:[#allocation2 + $0x60] sm:$0xff]  ;;  %v467_v20 = vld [vmem:[#allocation2 + $0xa8] sm:$0xff] }
  0xfb   :  { %1471 = vmatprep.mubr.msk.f32.mxu1 %vm1653_vm0, %v1654_v1  ;;  %1545 = vmatpush1.bf16.msra.mxu1 %v1544_v15  ;;  %v450_v15 = vld [vmem:[#allocation2 + $0x20] sm:$0xff]  ;;  %v469_v24 = vld [vmem:[#allocation2 + $0xb8] sm:$0xff] }
  0xfc   :  { %v237_v26 = vmax.f32 %v182_v23, 0.0  ;;  %1547 = vmatprep.subr.bf16.mxu1 %v1546_v17  ;;  %v475_v23 = vld [vmem:[#allocation2 + $0xe8] sm:$0xff] }
  0xfd   :  { %v186_v28 = vpop.f32.mrb[6].mxu0 }
  0xfe   :  { %v187_v29 = vadd.f32 %v1831_v60, %v186_v28  ;;  %v1421_v30 = vpop.f32.mrb[7].mxu0  ;;  %1472 = vmatmul.mubr.msk.f32.gmra.mrb[4].mxu1 %vm263_vm2, %v237_v26  ;;  %v1556_v26 = vpack.c.bf16 %v458_v16, %v450_v15  ;;  %v1895_v28 = vpack.c.bf16 %v460_v19, %v452_v18 }
  0xff   :  { %1474 = vmatprep.mubr.msk.f32.mxu1 %vm1653_vm0, %v1654_v1  ;;  %1549 = vmatpush1.bf16.msra.mxu1 %v1548_v25  ;;  %v477_v25 = vld [vmem:[#allocation2 + $0xf8] sm:$0xff]  ;;  %v474_v30 = vld [vmem:[#allocation2 + $0xe0] sm:$0xff] }
 0x100   :  { %v238_v31 = vmax.f32 %v187_v29, 0.0  ;;  %1551 = vmatprep.subr.bf16.mxu1 %v1550_v27  ;;  %v466_v29 = vld [vmem:[#allocation2 + $0xa0] sm:$0xff] }
 0x101   :  { %v191_v32 = vpop.f32.mrb[8].mxu0 }
 0x102   :  { %v192_v33 = vadd.f32 %v1831_v60, %v191_v32  ;;  %v1424_v34 = vpop.f32.mrb[9].mxu0  ;;  %1475 = vmatmul.mubr.msk.f32.gmra.mrb[6].mxu1 %vm263_vm2, %v238_v31  ;;  %v1558_v32 = vpack.c.bf16 %v475_v23, %v467_v20 }
 0x103   :  { %1477 = vmatprep.mubr.msk.f32.mxu1 %vm1653_vm0, %v1654_v1  ;;  %1553 = vmatpush1.bf16.msra.mxu1 %v1552_v8  ;;  %v468_v34 = vld [vmem:[#allocation2 + $0xb0] sm:$0xff] }
 0x104   :  { %v239_v35 = vmax.f32 %v192_v33, 0.0  ;;  %v1897_v33 = vpack.c.bf16 %v477_v25, %v469_v24 }
 0x105   :  { %v196_v36 = vpop.f32.mrb[10].mxu0 }
 0x106   :  { %v197_v37 = vadd.f32 %v1831_v60, %v196_v36  ;;  %v1427_v38 = vpop.f32.mrb[11].mxu0  ;;  %1478 = vmatmul.mubr.msk.f32.gmra.mrb[8].mxu1 %vm263_vm2, %v239_v35  ;;  %v476_v35 = vld [vmem:[#allocation2 + $0xf0] sm:$0xff]  ;;  %v483_v36 = vld [vmem:[#allocation2 + $0x128] sm:$0xff] }
 0x107   :  { %1480 = vmatprep.mubr.msk.f32.mxu1 %vm1653_vm0, %v1654_v1 }
 0x108   :  { %v240_v39 = vmax.f32 %v197_v37, 0.0 }
 0x109   :  { %v201_v40 = vpop.f32.mrb[12].mxu0 }
 0x10a   :  { %v202_v41 = vadd.f32 %v1831_v60, %v201_v40  ;;  %v1430_v42 = vpop.f32.mrb[13].mxu0  ;;  %1481 = vmatmul.mubr.msk.f32.gmra.mrb[10].mxu1 %vm263_vm2, %v240_v39  ;;  %v491_v39 = vld [vmem:[#allocation2 + $0x168] sm:$0xff]  ;;  %v485_v40 = vld [vmem:[#allocation2 + $0x138] sm:$0xff] }
 0x10b   :  { %1483 = vmatprep.mubr.msk.f32.mxu1 %vm1653_vm0, %v1654_v1 }
 0x10c   :  { %v241_v43 = vmax.f32 %v202_v41, 0.0  ;;  %v493_v41 = vld [vmem:[#allocation2 + $0x178] sm:$0xff] }
 0x10d   :  { %v206_v44 = vpop.f32.mrb[14].mxu0 }
 0x10e   :  { %v207_v45 = vadd.f32 %v1831_v60, %v206_v44  ;;  %v1433_v46 = vpop.f32.mrb[15].mxu0  ;;  %1484 = vmatmul.mubr.msk.f32.gmra.mrb[12].mxu1 %vm263_vm2, %v241_v43  ;;  %v1560_v43 = vpack.c.bf16 %v474_v30, %v466_v29  ;;  %v1909_v44 = vpack.c.bf16 %v476_v35, %v468_v34 }
 0x10f   :  { %1486 = vmatprep.mubr.msk.f32.mxu1 %vm1653_vm0, %v1654_v1  ;;  %v490_v46 = vld [vmem:[#allocation2 + $0x160] sm:$0xff] }
 0x110   :  { %v242_v47 = vmax.f32 %v207_v45, 0.0  ;;  %v482_v45 = vld [vmem:[#allocation2 + $0x120] sm:$0xff] }
 0x111   :  { %v211_v48 = vpop.f32.mrb[16].mxu0 }
 0x112   :  { %v212_v49 = vadd.f32 %v1831_v60, %v211_v48  ;;  %v1436_v50 = vpop.f32.mrb[17].mxu0  ;;  %1487 = vmatmul.mubr.msk.f32.gmra.mrb[14].mxu1 %vm263_vm2, %v242_v47  ;;  %v1562_v48 = vpack.c.bf16 %v491_v39, %v483_v36 }
 0x113   :  { %1489 = vmatprep.mubr.msk.f32.mxu1 %vm1653_vm0, %v1654_v1  ;;  %v484_v50 = vld [vmem:[#allocation2 + $0x130] sm:$0xff] }
 0x114   :  { %v243_v51 = vmax.f32 %v212_v49, 0.0  ;;  %v1912_v49 = vpack.c.bf16 %v493_v41, %v485_v40 }
 0x115   :  { %v216_v52 = vpop.f32.mrb[18].mxu0 }
 0x116   :  { %v217_v53 = vadd.f32 %v1831_v60, %v216_v52  ;;  %v1439_v54 = vpop.f32.mrb[19].mxu0  ;;  %1490 = vmatmul.mubr.msk.f32.gmra.mrb[16].mxu1 %vm263_vm2, %v243_v51  ;;  %v492_v51 = vld [vmem:[#allocation2 + $0x170] sm:$0xff]  ;;  %v499_v52 = vld [vmem:[#allocation2 + $0x1a8] sm:$0xff] }
 0x117   :  { %1492 = vmatprep.mubr.msk.f32.mxu1 %vm1653_vm0, %v1654_v1 }
 0x118   :  { %v244_v55 = vmax.f32 %v217_v53, 0.0 }
 0x119   :  { %v221_v56 = vpop.f32.mrb[20].mxu0 }
 0x11a   :  { %v222_v57 = vadd.f32 %v1831_v60, %v221_v56  ;;  %v1442_v58 = vpop.f32.mrb[21].mxu0  ;;  %1493 = vmatmul.mubr.msk.f32.gmra.mrb[18].mxu1 %vm263_vm2, %v244_v55  ;;  %v507_v55 = vld [vmem:[#allocation2 + $0x1e8] sm:$0xff]  ;;  %v501_v56 = vld [vmem:[#allocation2 + $0x1b8] sm:$0xff] }
 0x11b   :  { %1495 = vmatprep.mubr.msk.f32.mxu1 %vm1653_vm0, %v1654_v1 }
 0x11c   :  { %v245_v59 = vmax.f32 %v222_v57, 0.0  ;;  %v509_v57 = vld [vmem:[#allocation2 + $0x1f8] sm:$0xff] }
 0x11d   :  { %v226_v61 = vpop.f32.mrb[22].mxu0 }
 0x11e   :  { %v227_v62 = vadd.f32 %v1831_v60, %v226_v61  ;;  %v1445_v63 = vpop.f32.mrb[23].mxu0  ;;  %1496 = vmatmul.mubr.msk.f32.gmra.mrb[20].mxu1 %vm263_vm2, %v245_v59  ;;  %v1564_v59 = vpack.c.bf16 %v490_v46, %v482_v45  ;;  %v1924_v61 = vpack.c.bf16 %v492_v51, %v484_v50 }
 0x11f   :  { %1498 = vmatprep.mubr.msk.f32.mxu1 %vm1653_vm0, %v1654_v1 }
 0x120   :  { %v246_v0 = vmax.f32 %v227_v62, 0.0  ;;  %v498_v62 = vld [vmem:[#allocation2 + $0x1a0] sm:$0xff] }
 0x121   :  { %v231_v2 = vpop.f32.mrb[24].mxu0 }
 0x122   :  { %v232_v3 = vadd.f32 %v1831_v60, %v231_v2  ;;  %v1448_v4 = vpop.f32.mrb[25].mxu0  ;;  %1499 = vmatmul.mubr.msk.f32.gmra.mrb[22].mxu1 %vm263_vm2, %v246_v0  ;;  %v453_v60 = vld [vmem:[#allocation2 + $0x38] sm:$0xff]  ;;  %v1566_v0 = vpack.c.bf16 %v507_v55, %v499_v52  ;;  %v506_v2 = vld [vmem:[#allocation2 + $0x1e0] sm:$0xff] }
 0x123   :  { %1501 = vmatprep.mubr.msk.f32.mxu1 %vm1653_vm0, %v1654_v1  ;;  %v1884_v13 = vpack.c.bf16 %v461_v12, %v453_v60  ;;  %v500_v4 = vld [vmem:[#allocation2 + $0x1b0] sm:$0xff]  ;;  %v1568_v9 = vpack.c.bf16 %v506_v2, %v498_v62 }
 0x124   :  { %v247_v5 = vmax.f32 %v232_v3, 0.0  ;;  %v1927_v3 = vpack.c.bf16 %v509_v57, %v501_v56 }
 0x125   :  { %1586 = vmatprep.subr.bf16.mxu1 %v1884_v13 }
 0x126   :  { %1502 = vmatmul.mubr.msk.f32.gmra.mrb[24].mxu1 %vm263_vm2, %v247_v5  ;;  %v508_v5 = vld [vmem:[#allocation2 + $0x1f0] sm:$0xff] }
 0x127   :  { %798 = vmatprep.mubr.f32.mxu1 %v1654_v1  ;;  %v1939_v10 = vpack.c.bf16 %v508_v5, %v500_v4 }
 0x1c9   :  { %v369_v17 = vpop.f32.mrb[0].mxu1 }
 0x1ca   :  { %v370_v21 = vadd.f32 %v1890_v14, %v369_v17  ;;  %v1467_v22 = vpop.f32.mrb[1].mxu1 }
 0x1cc   :  { %v1893_v27 = vmax.f32 %v370_v21, 0.0 }
 0x1cd   :  { %v374_v31 = vpop.f32.mrb[2].mxu1 }
 0x1ce   :  { %v375_v37 = vadd.f32 %v1890_v14, %v374_v31  ;;  %v1470_v38 = vpop.f32.mrb[3].mxu1  ;;  %1312 = vmatmul.mubr.msk.f32.vlgmr.msra.gmra.mrb[26].mxu0 %vm263_vm2, %v1893_v27  ;;  %1325 = vmatmul.mubr.msk.f32.vlgmr.msra.gmra.mrb[26].mxu1 %vm263_vm2, %v1893_v27 }
 0x1cf   :  { %1557 = vmatpush1.bf16.msra.mxu0 %v1556_v26  ;;  %661 = vmatprep.mubr.f32.mxu0 %v1654_v1 }
 0x1d0   :  { %v1905_v42 = vmax.f32 %v375_v37, 0.0  ;;  %804 = vmatprep.mubr.f32.mxu1 %v1654_v1  ;;  %1590 = vmatpush1.bf16.msra.mxu1 %v1895_v28 }
 0x1d1   :  { %v379_v47 = vpop.f32.mrb[4].mxu1  ;;  %1559 = vmatprep.subr.bf16.mxu0 %v1558_v32  ;;  %1587 = vmatprep.subr.bf16.mxu1 %v1897_v33 }
 0x1d2   :  { %v380_v53 = vadd.f32 %v1890_v14, %v379_v47  ;;  %v1473_v54 = vpop.f32.mrb[5].mxu1  ;;  %1313 = vmatmul.mubr.msk.f32.gmra.mrb[28].mxu0 %vm263_vm2, %v1905_v42  ;;  %1326 = vmatmul.mubr.msk.f32.gmra.mrb[28].mxu1 %vm263_vm2, %v1905_v42 }
 0x1d3   :  { %667 = vmatprep.mubr.f32.mxu0 %v1654_v1  ;;  %810 = vmatprep.mubr.f32.mxu1 %v1654_v1 }
 0x1d4   :  { %v1921_v58 = vmax.f32 %v380_v53, 0.0  ;;  %1561 = vmatpush1.bf16.msra.mxu0 %v1560_v43  ;;  %1591 = vmatpush1.bf16.msra.mxu1 %v1909_v44 }
 0x1d5   :  { %v384_v63 = vpop.f32.mrb[6].mxu1  ;;  %1563 = vmatprep.subr.bf16.mxu0 %v1562_v48  ;;  %1588 = vmatprep.subr.bf16.mxu1 %v1912_v49 }
 0x1d6   :  { %v385_v6 = vadd.f32 %v1890_v14, %v384_v63  ;;  %v1476_v7 = vpop.f32.mrb[7].mxu1  ;;  %1314 = vmatmul.mubr.msk.f32.gmra.mrb[30].mxu0 %vm263_vm2, %v1921_v58  ;;  %1327 = vmatmul.mubr.msk.f32.gmra.mrb[30].mxu1 %vm263_vm2, %v1921_v58 }
 0x1d7   :  { %673 = vmatprep.mubr.f32.mxu0 %v1654_v1  ;;  %816 = vmatprep.mubr.f32.mxu1 %v1654_v1 }
 0x1d8   :  { %v1936_v8 = vmax.f32 %v385_v6, 0.0  ;;  %1565 = vmatpush1.bf16.msra.mxu0 %v1564_v59  ;;  %1592 = vmatpush1.bf16.msra.mxu1 %v1924_v61 }
 0x1d9   :  { %v389_v11 = vpop.f32.mrb[8].mxu1  ;;  %1567 = vmatprep.subr.bf16.mxu0 %v1566_v0  ;;  %1589 = vmatprep.subr.bf16.mxu1 %v1927_v3 }
 0x1da   :  { %v390_v60 = vadd.f32 %v1890_v14, %v389_v11  ;;  %v1479_v12 = vpop.f32.mrb[9].mxu1  ;;  %1315 = vmatmul.mubr.msk.f32.gmra.mrb[32].mxu0 %vm263_vm2, %v1936_v8  ;;  %1328 = vmatmul.mubr.msk.f32.gmra.mrb[32].mxu1 %vm263_vm2, %v1936_v8 }
 0x1db   :  { %679 = vmatprep.mubr.f32.mxu0 %v1654_v1  ;;  %822 = vmatprep.mubr.f32.mxu1 %v1654_v1 }
 0x1dc   :  { %v1949_v15 = vmax.f32 %v390_v60, 0.0  ;;  %1569 = vmatpush1.bf16.msra.mxu0 %v1568_v9  ;;  %1593 = vmatpush1.bf16.msra.mxu1 %v1939_v10 }
 0x1dd   :  { %v394_v16 = vpop.f32.mrb[10].mxu1  ;;  %1571 = vmatprep.subr.bf16.mxu0 %v1884_v13 }
 0x1de   :  { %v395_v17 = vadd.f32 %v1890_v14, %v394_v16  ;;  %v1482_v18 = vpop.f32.mrb[11].mxu1  ;;  %1316 = vmatmul.mubr.msk.f32.gmra.mrb[34].mxu0 %vm263_vm2, %v1949_v15  ;;  %1329 = vmatmul.mubr.msk.f32.gmra.mrb[34].mxu1 %vm263_vm2, %v1949_v15 }
 0x1df   :  { %685 = vmatprep.mubr.f32.mxu0 %v1654_v1  ;;  %828 = vmatprep.mubr.f32.mxu1 %v1654_v1 }
 0x1e0   :  { %v1960_v19 = vmax.f32 %v395_v17, 0.0 }
 0x1e1   :  { %v399_v20 = vpop.f32.mrb[12].mxu1 }
 0x1e2   :  { %v400_v21 = vadd.f32 %v1890_v14, %v399_v20  ;;  %v1485_v22 = vpop.f32.mrb[13].mxu1  ;;  %1317 = vmatmul.mubr.msk.f32.gmra.mrb[36].mxu0 %vm263_vm2, %v1960_v19  ;;  %1330 = vmatmul.mubr.msk.f32.gmra.mrb[36].mxu1 %vm263_vm2, %v1960_v19 }
 0x1e3   :  { %691 = vmatprep.mubr.f32.mxu0 %v1654_v1  ;;  %834 = vmatprep.mubr.f32.mxu1 %v1654_v1 }
 0x1e4   :  { %v1969_v13 = vmax.f32 %v400_v21, 0.0 }
 0x1e5   :  { %v404_v23 = vpop.f32.mrb[14].mxu1 }
 0x1e6   :  { %v405_v24 = vadd.f32 %v1890_v14, %v404_v23  ;;  %v1488_v25 = vpop.f32.mrb[15].mxu1  ;;  %1318 = vmatmul.mubr.msk.f32.gmra.mrb[38].mxu0 %vm263_vm2, %v1969_v13  ;;  %1331 = vmatmul.mubr.msk.f32.gmra.mrb[38].mxu1 %vm263_vm2, %v1969_v13 }
 0x1e7   :  { %697 = vmatprep.mubr.f32.mxu0 %v1654_v1  ;;  %840 = vmatprep.mubr.f32.mxu1 %v1654_v1 }
 0x1e8   :  { %v1978_v26 = vmax.f32 %v405_v24, 0.0 }
 0x1e9   :  { %v409_v29 = vpop.f32.mrb[16].mxu1 }
 0x1ea   :  { %v410_v30 = vadd.f32 %v1890_v14, %v409_v29  ;;  %v1491_v31 = vpop.f32.mrb[17].mxu1  ;;  %1319 = vmatmul.mubr.msk.f32.gmra.mrb[40].mxu0 %vm263_vm2, %v1978_v26  ;;  %1332 = vmatmul.mubr.msk.f32.gmra.mrb[40].mxu1 %vm263_vm2, %v1978_v26 }
 0x1eb   :  { %703 = vmatprep.mubr.f32.mxu0 %v1654_v1  ;;  %846 = vmatprep.mubr.f32.mxu1 %v1654_v1 }
 0x1ec   :  { %v1987_v32 = vmax.f32 %v410_v30, 0.0 }
 0x1ed   :  { %v414_v34 = vpop.f32.mrb[18].mxu1 }
 0x1ee   :  { %v415_v35 = vadd.f32 %v1890_v14, %v414_v34  ;;  %v1494_v36 = vpop.f32.mrb[19].mxu1  ;;  %1320 = vmatmul.mubr.msk.f32.gmra.mrb[42].mxu0 %vm263_vm2, %v1987_v32  ;;  %1333 = vmatmul.mubr.msk.f32.gmra.mrb[42].mxu1 %vm263_vm2, %v1987_v32 }
 0x1ef   :  { %709 = vmatprep.mubr.f32.mxu0 %v1654_v1  ;;  %852 = vmatprep.mubr.f32.mxu1 %v1654_v1 }
 0x1f0   :  { %v1996_v37 = vmax.f32 %v415_v35, 0.0 }
 0x1f1   :  { %v419_v38 = vpop.f32.mrb[20].mxu1 }
 0x1f2   :  { %v420_v39 = vadd.f32 %v1890_v14, %v419_v38  ;;  %v1497_v40 = vpop.f32.mrb[21].mxu1  ;;  %1321 = vmatmul.mubr.msk.f32.gmra.mrb[44].mxu0 %vm263_vm2, %v1996_v37  ;;  %1334 = vmatmul.mubr.msk.f32.gmra.mrb[44].mxu1 %vm263_vm2, %v1996_v37 }
 0x1f3   :  { %715 = vmatprep.mubr.f32.mxu0 %v1654_v1  ;;  %858 = vmatprep.mubr.f32.mxu1 %v1654_v1 }
 0x1f4   :  { %v2005_v41 = vmax.f32 %v420_v39, 0.0 }
 0x1f5   :  { %v424_v43 = vpop.f32.mrb[22].mxu1 }
 0x1f6   :  { %v425_v45 = vadd.f32 %v1890_v14, %v424_v43  ;;  %v1500_v46 = vpop.f32.mrb[23].mxu1  ;;  %1322 = vmatmul.mubr.msk.f32.gmra.mrb[46].mxu0 %vm263_vm2, %v2005_v41  ;;  %1335 = vmatmul.mubr.msk.f32.gmra.mrb[46].mxu1 %vm263_vm2, %v2005_v41 }
 0x1f7   :  { %721 = vmatprep.mubr.f32.mxu0 %v1654_v1  ;;  %864 = vmatprep.mubr.f32.mxu1 %v1654_v1 }
 0x1f8   :  { %v2014_v47 = vmax.f32 %v425_v45, 0.0 }
 0x1f9   :  { %v429_v48 = vpop.f32.mrb[24].mxu1 }
 0x1fa   :  { %v430_v50 = vadd.f32 %v1890_v14, %v429_v48  ;;  %v1503_v51 = vpop.f32.mrb[25].mxu1  ;;  %1323 = vmatmul.mubr.msk.f32.gmra.mrb[48].mxu0 %vm263_vm2, %v2014_v47  ;;  %1336 = vmatmul.mubr.msk.f32.gmra.mrb[48].mxu1 %vm263_vm2, %v2014_v47  ;;  %v512_v14 = vlaneseq }
 0x1fb   :  { %727 = vmatprep.mubr.f32.mxu0 %v1654_v1  ;;  %870 = vmatprep.mubr.f32.mxu1 %v1654_v1 }
 0x1fc   :  { %v445_v52 = vmax.f32 %v430_v50, 0.0 }
 0x1fe   :  { %1324 = vmatmul.mubr.msk.f32.gmra.mrb[50].mxu0 %vm263_vm2, %v445_v52  ;;  %1337 = vmatmul.mubr.msk.f32.gmra.mrb[50].mxu1 %vm263_vm2, %v445_v52 }
 0x1ff   :  { %941 = vmatprep.mubr.f32.mxu0 %v1654_v1  ;;  %1090 = vmatprep.mubr.f32.mxu1 %v1654_v1 }
 0x202   :  { %1338 = vmatmul.mubr.msk.f32.vlgmr.msra.gmra.mrb[52].mxu0 %vm263_vm2, %v1893_v27  ;;  %1352 = vmatmul.mubr.msk.f32.vlgmr.msra.gmra.mrb[52].mxu1 %vm263_vm2, %v1905_v42 }
 0x203   :  { %1573 = vmatpush1.bf16.msra.mxu0 %v1895_v28  ;;  %947 = vmatprep.mubr.f32.mxu0 %v1654_v1  ;;  %v2108_v28 = vshrl.u32 %v512_v14, 7 }
 0x204   :  { %1096 = vmatprep.mubr.f32.mxu1 %v1654_v1  ;;  %1575 = vmatprep.subr.bf16.mxu0 %v1897_v33 }
 0x205   :  { %v514_v33 = vsub.s32 0, %v2108_v28  ;;  %v526_v53 = vsub.s32 3, %v2108_v28 }
 0x206   :  { %1339 = vmatmul.mubr.msk.f32.gmra.mrb[54].mxu0 %vm263_vm2, %v1905_v42  ;;  %1353 = vmatmul.mubr.msk.f32.gmra.mrb[54].mxu1 %vm263_vm2, %v1921_v58  ;;  %v522_v42 = vsub.s32 2, %v2108_v28 }
 0x207   :  { %953 = vmatprep.mubr.f32.mxu0 %v1654_v1  ;;  %1102 = vmatprep.mubr.f32.mxu1 %v1654_v1 }
 0x208   :  { %1577 = vmatpush1.bf16.msra.mxu0 %v1909_v44  ;;  %v2115_v44 = vld [vmem:[%s2272_s6] sm:$0xff]  ;;  %s1655_s6 = smov [#allocation5]  }
 0x209   :  { %1579 = vmatprep.subr.bf16.mxu0 %v1912_v49  ;;  %v518_v49 = vsub.s32 1, %v2108_v28  ;;  %v2129_v55 = vrot.slane %v2115_v44, %v526_v53  ;;  %s1272_s20 = sshll.u32 %s1655_s6, 4  ;;  %s1273_s20 = int_to_ptr.vmem [resolvable:$true] %s1272_s20 }
 0x20a   :  { %1340 = vmatmul.mubr.msk.f32.gmra.mrb[56].mxu0 %vm263_vm2, %v1921_v58  ;;  %1354 = vmatmul.mubr.msk.f32.gmra.mrb[56].mxu1 %vm263_vm2, %v1936_v8  ;;  %s1623_s21 = scalar_lea.vmem %s1273_s20, 13312  ;;  %p1628_p9 = scmp.lt.s32.totalorder %s1273_s20, %s1273_s20 }
 0x20b   :  { %959 = vmatprep.mubr.f32.mxu0 %v1654_v1  ;;  %1108 = vmatprep.mubr.f32.mxu1 %v1654_v1  ;;  %v2126_v54 = vrot.slane %v2115_v44, %v518_v49  ;;  %p1624_p8 = scmp.ne.s32.totalorder %s1273_s20, %s1623_s21  ;;  %p1629_p10 = scmp.lt.s32.totalorder %s1623_s21, %s1623_s21 }
 0x20c   :  { %1581 = vmatpush1.bf16.msra.mxu0 %v1924_v61 }
 0x20d   :  { %1583 = vmatprep.subr.bf16.mxu0 %v1927_v3  ;;  %p1630_p11 = por %p1629_p10, %p1628_p9 }
 0x20e   :  { %1341 = vmatmul.mubr.msk.f32.gmra.mrb[58].mxu0 %vm263_vm2, %v1936_v8  ;;  %1355 = vmatmul.mubr.msk.f32.gmra.mrb[58].mxu1 %vm263_vm2, %v1949_v15 }
 0x20f   :  { %965 = vmatprep.mubr.f32.mxu0 %v1654_v1  ;;  %1114 = vmatprep.mubr.f32.mxu1 %v1654_v1  ;;  %p1631_p12 = pnand %p1630_p11, %p1624_p8 }
 0x210   :  { %1585 = vmatpush1.bf16.msra.mxu0 %v1939_v10 }
 0x212   :  { %1342 = vmatmul.mubr.msk.f32.gmra.mrb[60].mxu0 %vm263_vm2, %v1949_v15  ;;  %1356 = vmatmul.mubr.msk.f32.gmra.mrb[60].mxu1 %vm263_vm2, %v1960_v19 }
 0x213   :  { %971 = vmatprep.mubr.f32.mxu0 %v1654_v1  ;;  %1120 = vmatprep.mubr.f32.mxu1 %v1654_v1 }
 0x216   :  { %1343 = vmatmul.mubr.msk.f32.gmra.mrb[62].mxu0 %vm263_vm2, %v1960_v19  ;;  %1357 = vmatmul.mubr.msk.f32.gmra.mrb[62].mxu1 %vm263_vm2, %v1969_v13 }
 0x217   :  { %977 = vmatprep.mubr.f32.mxu0 %v1654_v1  ;;  %1126 = vmatprep.mubr.f32.mxu1 %v1654_v1 }
 0x21a   :  { %1344 = vmatmul.mubr.msk.f32.gmra.mrb[64].mxu0 %vm263_vm2, %v1969_v13  ;;  %1358 = vmatmul.mubr.msk.f32.gmra.mrb[64].mxu1 %vm263_vm2, %v1978_v26 }
 0x21b   :  { %983 = vmatprep.mubr.f32.mxu0 %v1654_v1  ;;  %1132 = vmatprep.mubr.f32.mxu1 %v1654_v1 }
 0x21e   :  { %1345 = vmatmul.mubr.msk.f32.gmra.mrb[66].mxu0 %vm263_vm2, %v1978_v26  ;;  %1359 = vmatmul.mubr.msk.f32.gmra.mrb[66].mxu1 %vm263_vm2, %v1987_v32 }
 0x21f   :  { %989 = vmatprep.mubr.f32.mxu0 %v1654_v1  ;;  %1138 = vmatprep.mubr.f32.mxu1 %v1654_v1 }
 0x222   :  { %1346 = vmatmul.mubr.msk.f32.gmra.mrb[68].mxu0 %vm263_vm2, %v1987_v32  ;;  %1360 = vmatmul.mubr.msk.f32.gmra.mrb[68].mxu1 %vm263_vm2, %v1996_v37 }
 0x223   :  { %995 = vmatprep.mubr.f32.mxu0 %v1654_v1  ;;  %1144 = vmatprep.mubr.f32.mxu1 %v1654_v1 }
 0x226   :  { %1347 = vmatmul.mubr.msk.f32.gmra.mrb[70].mxu0 %vm263_vm2, %v1996_v37  ;;  %1361 = vmatmul.mubr.msk.f32.gmra.mrb[70].mxu1 %vm263_vm2, %v2005_v41 }
 0x227   :  { %1001 = vmatprep.mubr.f32.mxu0 %v1654_v1  ;;  %1150 = vmatprep.mubr.f32.mxu1 %v1654_v1 }
 0x22a   :  { %1348 = vmatmul.mubr.msk.f32.gmra.mrb[72].mxu0 %vm263_vm2, %v2005_v41  ;;  %1362 = vmatmul.mubr.msk.f32.gmra.mrb[72].mxu1 %vm263_vm2, %v2014_v47 }
 0x22b   :  { %1007 = vmatprep.mubr.f32.mxu0 %v1654_v1  ;;  %1156 = vmatprep.mubr.f32.mxu1 %v1654_v1 }
 0x22e   :  { %1349 = vmatmul.mubr.msk.f32.gmra.mrb[74].mxu0 %vm263_vm2, %v2014_v47  ;;  %1363 = vmatmul.mubr.msk.f32.gmra.mrb[74].mxu1 %vm263_vm2, %v445_v52 }
 0x22f   :  { %1013 = vmatprep.mubr.f32.mxu0 %v1654_v1 }
 0x232   :  { %1350 = vmatmul.mubr.msk.f32.gmra.mrb[76].mxu0 %vm263_vm2, %v445_v52 }
 0x233   :  { %1084 = vmatprep.mubr.f32.mxu0 %v1654_v1  ;;  %v2120_v1 = vrot.slane %v2115_v44, %v514_v33 }
 0x236   :  { %1351 = vmatmul.mubr.msk.f32.vlgmr.msra.gmra.mrb[78].mxu0 %vm263_vm2, %v1893_v27  ;;  %v2123_v27 = vrot.slane %v2115_v44, %v522_v42 }
 0x2a1   :  { %v657_v56 = vpop.f32.mrb[26].mxu0  ;;  %v800_v57 = vpop.f32.mrb[26].mxu1 }
 0x2a2   :  { %v658_v58 = vadd.f32 %v657_v56, %v2120_v1  ;;  %v801_v59 = vadd.f32 %v800_v57, %v2123_v27  ;;  %v659_v61 = vpop.f32.mrb[27].mxu0  ;;  %v802_v62 = vpop.f32.mrb[27].mxu1 }
 0x2a3   :  { %v660_v63 = vadd.f32 %v659_v61, %v2126_v54  ;;  %v803_v0 = vadd.f32 %v802_v62, %v2129_v55 }
 0x2a4   :  { %1163 = vst [vmem:[#allocation5] sm:$0xff] %v658_v58  ;;  %1165 = vst [vmem:[#allocation5 + $0x10] sm:$0xff] %v801_v59 }
 0x2a5   :  { %1164 = vst [vmem:[#allocation5 + $0x8] sm:$0xff] %v660_v63  ;;  %1166 = vst [vmem:[#allocation5 + $0x18] sm:$0xff] %v803_v0  ;;  %v663_v2 = vpop.f32.mrb[28].mxu0  ;;  %v806_v3 = vpop.f32.mrb[28].mxu1 }
 0x2a6   :  { %v664_v4 = vadd.f32 %v663_v2, %v2120_v1  ;;  %v807_v5 = vadd.f32 %v806_v3, %v2123_v27  ;;  %v665_v6 = vpop.f32.mrb[29].mxu0  ;;  %v808_v7 = vpop.f32.mrb[29].mxu1 }
 0x2a7   :  { %v666_v8 = vadd.f32 %v665_v6, %v2126_v54  ;;  %v809_v9 = vadd.f32 %v808_v7, %v2129_v55 }
 0x2a8   :  { %1171 = vst [vmem:[#allocation5 + $0x40] sm:$0xff] %v664_v4  ;;  %1173 = vst [vmem:[#allocation5 + $0x50] sm:$0xff] %v807_v5 }
 0x2a9   :  { %1172 = vst [vmem:[#allocation5 + $0x48] sm:$0xff] %v666_v8  ;;  %1174 = vst [vmem:[#allocation5 + $0x58] sm:$0xff] %v809_v9  ;;  %v669_v10 = vpop.f32.mrb[30].mxu0  ;;  %v812_v11 = vpop.f32.mrb[30].mxu1 }
 0x2aa   :  { %v670_v60 = vadd.f32 %v669_v10, %v2120_v1  ;;  %v813_v12 = vadd.f32 %v812_v11, %v2123_v27  ;;  %v671_v15 = vpop.f32.mrb[31].mxu0  ;;  %v814_v16 = vpop.f32.mrb[31].mxu1 }
 0x2ab   :  { %v672_v17 = vadd.f32 %v671_v15, %v2126_v54  ;;  %v815_v18 = vadd.f32 %v814_v16, %v2129_v55 }
 0x2ac   :  { %1179 = vst [vmem:[#allocation5 + $0x80] sm:$0xff] %v670_v60  ;;  %1181 = vst [vmem:[#allocation5 + $0x90] sm:$0xff] %v813_v12 }
 0x2ad   :  { %1180 = vst [vmem:[#allocation5 + $0x88] sm:$0xff] %v672_v17  ;;  %1182 = vst [vmem:[#allocation5 + $0x98] sm:$0xff] %v815_v18  ;;  %v675_v19 = vpop.f32.mrb[32].mxu0  ;;  %v818_v20 = vpop.f32.mrb[32].mxu1 }
 0x2ae   :  { %v676_v21 = vadd.f32 %v675_v19, %v2120_v1  ;;  %v819_v22 = vadd.f32 %v818_v20, %v2123_v27  ;;  %v677_v13 = vpop.f32.mrb[33].mxu0  ;;  %v820_v23 = vpop.f32.mrb[33].mxu1 }
 0x2af   :  { %v678_v24 = vadd.f32 %v677_v13, %v2126_v54  ;;  %v821_v25 = vadd.f32 %v820_v23, %v2129_v55 }
 0x2b0   :  { %1187 = vst [vmem:[#allocation5 + $0xc0] sm:$0xff] %v676_v21  ;;  %1189 = vst [vmem:[#allocation5 + $0xd0] sm:$0xff] %v819_v22 }
 0x2b1   :  { %1188 = vst [vmem:[#allocation5 + $0xc8] sm:$0xff] %v678_v24  ;;  %1190 = vst [vmem:[#allocation5 + $0xd8] sm:$0xff] %v821_v25  ;;  %v681_v26 = vpop.f32.mrb[34].mxu0  ;;  %v824_v29 = vpop.f32.mrb[34].mxu1 }
 0x2b2   :  { %v682_v30 = vadd.f32 %v681_v26, %v2120_v1  ;;  %v825_v31 = vadd.f32 %v824_v29, %v2123_v27  ;;  %v683_v32 = vpop.f32.mrb[35].mxu0  ;;  %v826_v34 = vpop.f32.mrb[35].mxu1 }
 0x2b3   :  { %v684_v35 = vadd.f32 %v683_v32, %v2126_v54  ;;  %v827_v36 = vadd.f32 %v826_v34, %v2129_v55  ;;  %v530_v32 = vsub.s32 4, %v2108_v28  ;;  %v538_v34 = vsub.s32 6, %v2108_v28 }
 0x2b4   :  { %1195 = vst [vmem:[#allocation5 + $0x100] sm:$0xff] %v682_v30  ;;  %1197 = vst [vmem:[#allocation5 + $0x110] sm:$0xff] %v825_v31 }
 0x2b5   :  { %1196 = vst [vmem:[#allocation5 + $0x108] sm:$0xff] %v684_v35  ;;  %1198 = vst [vmem:[#allocation5 + $0x118] sm:$0xff] %v827_v36  ;;  %v687_v37 = vpop.f32.mrb[36].mxu0  ;;  %v830_v38 = vpop.f32.mrb[36].mxu1 }
 0x2b6   :  { %v688_v39 = vadd.f32 %v687_v37, %v2120_v1  ;;  %v831_v40 = vadd.f32 %v830_v38, %v2123_v27  ;;  %v689_v41 = vpop.f32.mrb[37].mxu0  ;;  %v832_v43 = vpop.f32.mrb[37].mxu1  ;;  %v534_v37 = vsub.s32 5, %v2108_v28  ;;  %v542_v38 = vsub.s32 7, %v2108_v28 }
 0x2b7   :  { %v690_v45 = vadd.f32 %v689_v41, %v2126_v54  ;;  %v833_v46 = vadd.f32 %v832_v43, %v2129_v55 }
 0x2b8   :  { %1203 = vst [vmem:[#allocation5 + $0x140] sm:$0xff] %v688_v39  ;;  %1205 = vst [vmem:[#allocation5 + $0x150] sm:$0xff] %v831_v40 }
 0x2b9   :  { %1204 = vst [vmem:[#allocation5 + $0x148] sm:$0xff] %v690_v45  ;;  %1206 = vst [vmem:[#allocation5 + $0x158] sm:$0xff] %v833_v46  ;;  %v693_v47 = vpop.f32.mrb[38].mxu0  ;;  %v836_v48 = vpop.f32.mrb[38].mxu1 }
 0x2ba   :  { %v694_v50 = vadd.f32 %v693_v47, %v2120_v1  ;;  %v837_v51 = vadd.f32 %v836_v48, %v2123_v27  ;;  %v695_v52 = vpop.f32.mrb[39].mxu0  ;;  %v838_v14 = vpop.f32.mrb[39].mxu1  ;;  %v2186_v47 = vrot.slane %v2115_v44, %v530_v32  ;;  %v2189_v48 = vrot.slane %v2115_v44, %v538_v34 }
 0x2bb   :  { %v696_v33 = vadd.f32 %v695_v52, %v2126_v54  ;;  %v839_v42 = vadd.f32 %v838_v14, %v2129_v55  ;;  %v2197_v52 = vrot.slane %v2115_v44, %v542_v38 }
 0x2bc   :  { %1211 = vst [vmem:[#allocation5 + $0x180] sm:$0xff] %v694_v50  ;;  %1213 = vst [vmem:[#allocation5 + $0x190] sm:$0xff] %v837_v51  ;;  %v2194_v51 = vrot.slane %v2115_v44, %v534_v37 }
 0x2bd   :  { %1212 = vst [vmem:[#allocation5 + $0x188] sm:$0xff] %v696_v33  ;;  %1214 = vst [vmem:[#allocation5 + $0x198] sm:$0xff] %v839_v42  ;;  %v699_v49 = vpop.f32.mrb[40].mxu0  ;;  %v842_v53 = vpop.f32.mrb[40].mxu1 }
 0x2be   :  { %v700_v56 = vadd.f32 %v699_v49, %v2120_v1  ;;  %v843_v57 = vadd.f32 %v842_v53, %v2123_v27  ;;  %v701_v58 = vpop.f32.mrb[41].mxu0  ;;  %v844_v59 = vpop.f32.mrb[41].mxu1 }
 0x2bf   :  { %v702_v61 = vadd.f32 %v701_v58, %v2126_v54  ;;  %v845_v62 = vadd.f32 %v844_v59, %v2129_v55 }
 0x2c0   :  { %1219 = vst [vmem:[#allocation5 + $0x1c0] sm:$0xff] %v700_v56  ;;  %1221 = vst [vmem:[#allocation5 + $0x1d0] sm:$0xff] %v843_v57 }
 0x2c1   :  { %1220 = vst [vmem:[#allocation5 + $0x1c8] sm:$0xff] %v702_v61  ;;  %1222 = vst [vmem:[#allocation5 + $0x1d8] sm:$0xff] %v845_v62  ;;  %v705_v63 = vpop.f32.mrb[42].mxu0  ;;  %v848_v0 = vpop.f32.mrb[42].mxu1 }
 0x2c2   :  { %v706_v2 = vadd.f32 %v705_v63, %v2120_v1  ;;  %v849_v3 = vadd.f32 %v848_v0, %v2123_v27  ;;  %v707_v4 = vpop.f32.mrb[43].mxu0  ;;  %v850_v5 = vpop.f32.mrb[43].mxu1 }
 0x2c3   :  { %v708_v6 = vadd.f32 %v707_v4, %v2126_v54  ;;  %v851_v7 = vadd.f32 %v850_v5, %v2129_v55 }
 0x2c4   :  { %1227 = vst [vmem:[#allocation5 + $0x200] sm:$0xff] %v706_v2  ;;  %1229 = vst [vmem:[#allocation5 + $0x210] sm:$0xff] %v849_v3 }
 0x2c5   :  { %1228 = vst [vmem:[#allocation5 + $0x208] sm:$0xff] %v708_v6  ;;  %1230 = vst [vmem:[#allocation5 + $0x218] sm:$0xff] %v851_v7  ;;  %v711_v8 = vpop.f32.mrb[44].mxu0  ;;  %v854_v9 = vpop.f32.mrb[44].mxu1 }
 0x2c6   :  { %v712_v10 = vadd.f32 %v711_v8, %v2120_v1  ;;  %v855_v11 = vadd.f32 %v854_v9, %v2123_v27  ;;  %v713_v60 = vpop.f32.mrb[45].mxu0  ;;  %v856_v12 = vpop.f32.mrb[45].mxu1 }
 0x2c7   :  { %v714_v15 = vadd.f32 %v713_v60, %v2126_v54  ;;  %v857_v16 = vadd.f32 %v856_v12, %v2129_v55 }
 0x2c8   :  { %1235 = vst [vmem:[#allocation5 + $0x240] sm:$0xff] %v712_v10  ;;  %1237 = vst [vmem:[#allocation5 + $0x250] sm:$0xff] %v855_v11 }
 0x2c9   :  { %1236 = vst [vmem:[#allocation5 + $0x248] sm:$0xff] %v714_v15  ;;  %1238 = vst [vmem:[#allocation5 + $0x258] sm:$0xff] %v857_v16  ;;  %v717_v17 = vpop.f32.mrb[46].mxu0  ;;  %v860_v18 = vpop.f32.mrb[46].mxu1 }
 0x2ca   :  { %v718_v19 = vadd.f32 %v717_v17, %v2120_v1  ;;  %v861_v20 = vadd.f32 %v860_v18, %v2123_v27  ;;  %v719_v21 = vpop.f32.mrb[47].mxu0  ;;  %v862_v22 = vpop.f32.mrb[47].mxu1 }
 0x2cb   :  { %v720_v13 = vadd.f32 %v719_v21, %v2126_v54  ;;  %v863_v23 = vadd.f32 %v862_v22, %v2129_v55 }
 0x2cc   :  { %1243 = vst [vmem:[#allocation5 + $0x280] sm:$0xff] %v718_v19  ;;  %1245 = vst [vmem:[#allocation5 + $0x290] sm:$0xff] %v861_v20 }
 0x2cd   :  { %1244 = vst [vmem:[#allocation5 + $0x288] sm:$0xff] %v720_v13  ;;  %1246 = vst [vmem:[#allocation5 + $0x298] sm:$0xff] %v863_v23  ;;  %v723_v24 = vpop.f32.mrb[48].mxu0  ;;  %v866_v25 = vpop.f32.mrb[48].mxu1 }
 0x2ce   :  { %v724_v26 = vadd.f32 %v723_v24, %v2120_v1  ;;  %v867_v29 = vadd.f32 %v866_v25, %v2123_v27  ;;  %v725_v30 = vpop.f32.mrb[49].mxu0  ;;  %v868_v31 = vpop.f32.mrb[49].mxu1 }
 0x2cf   :  { %v726_v35 = vadd.f32 %v725_v30, %v2126_v54  ;;  %v869_v36 = vadd.f32 %v868_v31, %v2129_v55 }
 0x2d0   :  { %1251 = vst [vmem:[#allocation5 + $0x2c0] sm:$0xff] %v724_v26  ;;  %1253 = vst [vmem:[#allocation5 + $0x2d0] sm:$0xff] %v867_v29 }
 0x2d1   :  { %1252 = vst [vmem:[#allocation5 + $0x2c8] sm:$0xff] %v726_v35  ;;  %1254 = vst [vmem:[#allocation5 + $0x2d8] sm:$0xff] %v869_v36  ;;  %v729_v39 = vpop.f32.mrb[50].mxu0  ;;  %v872_v40 = vpop.f32.mrb[50].mxu1 }
 0x2d2   :  { %v730_v41 = vadd.f32 %v729_v39, %v2120_v1  ;;  %v873_v43 = vadd.f32 %v872_v40, %v2123_v27  ;;  %v731_v45 = vpop.f32.mrb[51].mxu0  ;;  %v874_v46 = vpop.f32.mrb[51].mxu1 }
 0x2d3   :  { %v732_v28 = vadd.f32 %v731_v45, %v2126_v54  ;;  %v875_v50 = vadd.f32 %v874_v46, %v2129_v55 }
 0x2d4   :  { %1259 = vst [vmem:[#allocation5 + $0x300] sm:$0xff] %v730_v41  ;;  %1261 = vst [vmem:[#allocation5 + $0x310] sm:$0xff] %v873_v43 }
 0x2d5   :  { %1260 = vst [vmem:[#allocation5 + $0x308] sm:$0xff] %v732_v28  ;;  %1262 = vst [vmem:[#allocation5 + $0x318] sm:$0xff] %v875_v50  ;;  %v943_v1 = vpop.f32.mrb[52].mxu0  ;;  %v1092_v27 = vpop.f32.mrb[52].mxu1 }
 0x2d6   :  { %v944_v14 = vadd.f32 %v943_v1, %v2186_v47  ;;  %v1093_v33 = vadd.f32 %v1092_v27, %v2189_v48  ;;  %v945_v42 = vpop.f32.mrb[53].mxu0  ;;  %v1094_v54 = vpop.f32.mrb[53].mxu1 }
 0x2d7   :  { %v946_v55 = vadd.f32 %v945_v42, %v2194_v51  ;;  %v1095_v49 = vadd.f32 %v1094_v54, %v2197_v52 }
 0x2d8   :  { %1167 = vst [vmem:[#allocation5 + $0x20] sm:$0xff] %v944_v14  ;;  %1177 = vst [vmem:[#allocation5 + $0x70] sm:$0xff] %v1093_v33 }
 0x2d9   :  { %1168 = vst [vmem:[#allocation5 + $0x28] sm:$0xff] %v946_v55  ;;  %1178 = vst [vmem:[#allocation5 + $0x78] sm:$0xff] %v1095_v49  ;;  %v949_v44 = vpop.f32.mrb[54].mxu0  ;;  %v1098_v53 = vpop.f32.mrb[54].mxu1 }
 0x2da   :  { %v950_v56 = vadd.f32 %v949_v44, %v2186_v47  ;;  %v1099_v57 = vadd.f32 %v1098_v53, %v2189_v48  ;;  %v951_v58 = vpop.f32.mrb[55].mxu0  ;;  %v1100_v59 = vpop.f32.mrb[55].mxu1 }
 0x2db   :  { %v952_v61 = vadd.f32 %v951_v58, %v2194_v51  ;;  %v1101_v62 = vadd.f32 %v1100_v59, %v2197_v52 }
 0x2dc   :  { %1175 = vst [vmem:[#allocation5 + $0x60] sm:$0xff] %v950_v56  ;;  %1185 = vst [vmem:[#allocation5 + $0xb0] sm:$0xff] %v1099_v57 }
 0x2dd   :  { %1176 = vst [vmem:[#allocation5 + $0x68] sm:$0xff] %v952_v61  ;;  %1186 = vst [vmem:[#allocation5 + $0xb8] sm:$0xff] %v1101_v62  ;;  %v955_v63 = vpop.f32.mrb[56].mxu0  ;;  %v1104_v0 = vpop.f32.mrb[56].mxu1 }
 0x2de   :  { %v956_v2 = vadd.f32 %v955_v63, %v2186_v47  ;;  %v1105_v3 = vadd.f32 %v1104_v0, %v2189_v48  ;;  %v957_v4 = vpop.f32.mrb[57].mxu0  ;;  %v1106_v5 = vpop.f32.mrb[57].mxu1 }
 0x2df   :  { %v958_v6 = vadd.f32 %v957_v4, %v2194_v51  ;;  %v1107_v7 = vadd.f32 %v1106_v5, %v2197_v52 }
 0x2e0   :  { %1183 = vst [vmem:[#allocation5 + $0xa0] sm:$0xff] %v956_v2  ;;  %1193 = vst [vmem:[#allocation5 + $0xf0] sm:$0xff] %v1105_v3 }
 0x2e1   :  { %1184 = vst [vmem:[#allocation5 + $0xa8] sm:$0xff] %v958_v6  ;;  %1194 = vst [vmem:[#allocation5 + $0xf8] sm:$0xff] %v1107_v7  ;;  %v961_v8 = vpop.f32.mrb[58].mxu0  ;;  %v1110_v9 = vpop.f32.mrb[58].mxu1 }
 0x2e2   :  { %v962_v10 = vadd.f32 %v961_v8, %v2186_v47  ;;  %v1111_v11 = vadd.f32 %v1110_v9, %v2189_v48  ;;  %v963_v60 = vpop.f32.mrb[59].mxu0  ;;  %v1112_v12 = vpop.f32.mrb[59].mxu1 }
 0x2e3   :  { %v964_v15 = vadd.f32 %v963_v60, %v2194_v51  ;;  %v1113_v16 = vadd.f32 %v1112_v12, %v2197_v52 }
 0x2e4   :  { %1191 = vst [vmem:[#allocation5 + $0xe0] sm:$0xff] %v962_v10  ;;  %1201 = vst [vmem:[#allocation5 + $0x130] sm:$0xff] %v1111_v11 }
 0x2e5   :  { %1192 = vst [vmem:[#allocation5 + $0xe8] sm:$0xff] %v964_v15  ;;  %1202 = vst [vmem:[#allocation5 + $0x138] sm:$0xff] %v1113_v16  ;;  %v967_v17 = vpop.f32.mrb[60].mxu0  ;;  %v1116_v18 = vpop.f32.mrb[60].mxu1 }
 0x2e6   :  { %v968_v19 = vadd.f32 %v967_v17, %v2186_v47  ;;  %v1117_v20 = vadd.f32 %v1116_v18, %v2189_v48  ;;  %v969_v21 = vpop.f32.mrb[61].mxu0  ;;  %v1118_v22 = vpop.f32.mrb[61].mxu1 }
 0x2e7   :  { %v970_v13 = vadd.f32 %v969_v21, %v2194_v51  ;;  %v1119_v23 = vadd.f32 %v1118_v22, %v2197_v52 }
 0x2e8   :  { %1199 = vst [vmem:[#allocation5 + $0x120] sm:$0xff] %v968_v19  ;;  %1209 = vst [vmem:[#allocation5 + $0x170] sm:$0xff] %v1117_v20 }
 0x2e9   :  { %1200 = vst [vmem:[#allocation5 + $0x128] sm:$0xff] %v970_v13  ;;  %1210 = vst [vmem:[#allocation5 + $0x178] sm:$0xff] %v1119_v23  ;;  %v973_v24 = vpop.f32.mrb[62].mxu0  ;;  %v1122_v25 = vpop.f32.mrb[62].mxu1 }
 0x2ea   :  { %v974_v26 = vadd.f32 %v973_v24, %v2186_v47  ;;  %v1123_v29 = vadd.f32 %v1122_v25, %v2189_v48  ;;  %v975_v30 = vpop.f32.mrb[63].mxu0  ;;  %v1124_v31 = vpop.f32.mrb[63].mxu1 }
 0x2eb   :  { %v976_v32 = vadd.f32 %v975_v30, %v2194_v51  ;;  %v1125_v34 = vadd.f32 %v1124_v31, %v2197_v52 }
 0x2ec   :  { %1207 = vst [vmem:[#allocation5 + $0x160] sm:$0xff] %v974_v26  ;;  %1217 = vst [vmem:[#allocation5 + $0x1b0] sm:$0xff] %v1123_v29 }
 0x2ed   :  { %1208 = vst [vmem:[#allocation5 + $0x168] sm:$0xff] %v976_v32  ;;  %1218 = vst [vmem:[#allocation5 + $0x1b8] sm:$0xff] %v1125_v34  ;;  %v979_v35 = vpop.f32.mrb[64].mxu0  ;;  %v1128_v36 = vpop.f32.mrb[64].mxu1 }
 0x2ee   :  { %v980_v37 = vadd.f32 %v979_v35, %v2186_v47  ;;  %v1129_v38 = vadd.f32 %v1128_v36, %v2189_v48  ;;  %v981_v39 = vpop.f32.mrb[65].mxu0  ;;  %v1130_v40 = vpop.f32.mrb[65].mxu1 }
 0x2ef   :  { %v982_v41 = vadd.f32 %v981_v39, %v2194_v51  ;;  %v1131_v43 = vadd.f32 %v1130_v40, %v2197_v52 }
 0x2f0   :  { %1215 = vst [vmem:[#allocation5 + $0x1a0] sm:$0xff] %v980_v37  ;;  %1225 = vst [vmem:[#allocation5 + $0x1f0] sm:$0xff] %v1129_v38 }
 0x2f1   :  { %1216 = vst [vmem:[#allocation5 + $0x1a8] sm:$0xff] %v982_v41  ;;  %1226 = vst [vmem:[#allocation5 + $0x1f8] sm:$0xff] %v1131_v43  ;;  %v985_v45 = vpop.f32.mrb[66].mxu0  ;;  %v1134_v46 = vpop.f32.mrb[66].mxu1 }
 0x2f2   :  { %v986_v28 = vadd.f32 %v985_v45, %v2186_v47  ;;  %v1135_v50 = vadd.f32 %v1134_v46, %v2189_v48  ;;  %v987_v1 = vpop.f32.mrb[67].mxu0  ;;  %v1136_v27 = vpop.f32.mrb[67].mxu1 }
 0x2f3   :  { %v988_v14 = vadd.f32 %v987_v1, %v2194_v51  ;;  %v1137_v33 = vadd.f32 %v1136_v27, %v2197_v52 }
 0x2f4   :  { %1223 = vst [vmem:[#allocation5 + $0x1e0] sm:$0xff] %v986_v28  ;;  %1233 = vst [vmem:[#allocation5 + $0x230] sm:$0xff] %v1135_v50 }
 0x2f5   :  { %1224 = vst [vmem:[#allocation5 + $0x1e8] sm:$0xff] %v988_v14  ;;  %1234 = vst [vmem:[#allocation5 + $0x238] sm:$0xff] %v1137_v33  ;;  %v991_v42 = vpop.f32.mrb[68].mxu0  ;;  %v1140_v54 = vpop.f32.mrb[68].mxu1 }
 0x2f6   :  { %v992_v55 = vadd.f32 %v991_v42, %v2186_v47  ;;  %v1141_v49 = vadd.f32 %v1140_v54, %v2189_v48  ;;  %v993_v44 = vpop.f32.mrb[69].mxu0  ;;  %v1142_v53 = vpop.f32.mrb[69].mxu1 }
 0x2f7   :  { %v994_v56 = vadd.f32 %v993_v44, %v2194_v51  ;;  %v1143_v57 = vadd.f32 %v1142_v53, %v2197_v52 }
 0x2f8   :  { %1231 = vst [vmem:[#allocation5 + $0x220] sm:$0xff] %v992_v55  ;;  %1241 = vst [vmem:[#allocation5 + $0x270] sm:$0xff] %v1141_v49 }
 0x2f9   :  { %1232 = vst [vmem:[#allocation5 + $0x228] sm:$0xff] %v994_v56  ;;  %1242 = vst [vmem:[#allocation5 + $0x278] sm:$0xff] %v1143_v57  ;;  %v997_v58 = vpop.f32.mrb[70].mxu0  ;;  %v1146_v59 = vpop.f32.mrb[70].mxu1 }
 0x2fa   :  { %v998_v61 = vadd.f32 %v997_v58, %v2186_v47  ;;  %v1147_v62 = vadd.f32 %v1146_v59, %v2189_v48  ;;  %v999_v63 = vpop.f32.mrb[71].mxu0  ;;  %v1148_v0 = vpop.f32.mrb[71].mxu1 }
 0x2fb   :  { %v1000_v2 = vadd.f32 %v999_v63, %v2194_v51  ;;  %v1149_v3 = vadd.f32 %v1148_v0, %v2197_v52 }
 0x2fc   :  { %1239 = vst [vmem:[#allocation5 + $0x260] sm:$0xff] %v998_v61  ;;  %1249 = vst [vmem:[#allocation5 + $0x2b0] sm:$0xff] %v1147_v62 }
 0x2fd   :  { %1240 = vst [vmem:[#allocation5 + $0x268] sm:$0xff] %v1000_v2  ;;  %1250 = vst [vmem:[#allocation5 + $0x2b8] sm:$0xff] %v1149_v3  ;;  %v1003_v4 = vpop.f32.mrb[72].mxu0  ;;  %v1152_v5 = vpop.f32.mrb[72].mxu1 }
 0x2fe   :  { %v1004_v6 = vadd.f32 %v1003_v4, %v2186_v47  ;;  %v1153_v7 = vadd.f32 %v1152_v5, %v2189_v48  ;;  %v1005_v8 = vpop.f32.mrb[73].mxu0  ;;  %v1154_v9 = vpop.f32.mrb[73].mxu1 }
 0x2ff   :  { %v1006_v10 = vadd.f32 %v1005_v8, %v2194_v51  ;;  %v1155_v11 = vadd.f32 %v1154_v9, %v2197_v52 }
 0x300   :  { %1247 = vst [vmem:[#allocation5 + $0x2a0] sm:$0xff] %v1004_v6  ;;  %1257 = vst [vmem:[#allocation5 + $0x2f0] sm:$0xff] %v1153_v7 }
 0x301   :  { %1248 = vst [vmem:[#allocation5 + $0x2a8] sm:$0xff] %v1006_v10  ;;  %1258 = vst [vmem:[#allocation5 + $0x2f8] sm:$0xff] %v1155_v11  ;;  %v1009_v60 = vpop.f32.mrb[74].mxu0  ;;  %v1158_v12 = vpop.f32.mrb[74].mxu1 }
 0x302   :  { %v1010_v15 = vadd.f32 %v1009_v60, %v2186_v47  ;;  %v1159_v16 = vadd.f32 %v1158_v12, %v2189_v48  ;;  %v1011_v17 = vpop.f32.mrb[75].mxu0  ;;  %v1160_v18 = vpop.f32.mrb[75].mxu1 }
 0x303   :  { %v1012_v19 = vadd.f32 %v1011_v17, %v2194_v51  ;;  %v1161_v20 = vadd.f32 %v1160_v18, %v2197_v52 }
 0x304   :  { %1255 = vst [vmem:[#allocation5 + $0x2e0] sm:$0xff] %v1010_v15  ;;  %1265 = vst [vmem:[#allocation5 + $0x330] sm:$0xff] %v1159_v16 }
 0x305   :  { %1256 = vst [vmem:[#allocation5 + $0x2e8] sm:$0xff] %v1012_v19  ;;  %1266 = vst [vmem:[#allocation5 + $0x338] sm:$0xff] %v1161_v20  ;;  %v1015_v21 = vpop.f32.mrb[76].mxu0 }
 0x306   :  { %v1016_v22 = vadd.f32 %v1015_v21, %v2186_v47  ;;  %v1017_v13 = vpop.f32.mrb[77].mxu0 }
 0x307   :  { %v1018_v23 = vadd.f32 %v1017_v13, %v2194_v51 }
 0x308   :  { %1263 = vst [vmem:[#allocation5 + $0x320] sm:$0xff] %v1016_v22 }
 0x309   :  { %1264 = vst [vmem:[#allocation5 + $0x328] sm:$0xff] %v1018_v23  ;;  %v1086_v24 = vpop.f32.mrb[78].mxu0 }
 0x30a   :  { %v1087_v25 = vadd.f32 %v1086_v24, %v2189_v48  ;;  %v1088_v26 = vpop.f32.mrb[79].mxu0 }
 0x30b   :  { %v1089_v29 = vadd.f32 %v1088_v26, %v2197_v52 }
 0x30c   :  { %1169 = vst [vmem:[#allocation5 + $0x30] sm:$0xff] %v1087_v25 }
 0x30d   :  { %1170 = vst [vmem:[#allocation5 + $0x38] sm:$0xff] %v1089_v29 }
 0x30e   :  { %1634 = shalt.err (!%p1631_p12)
}
 0x30f   :  { %s1635_s24 = scalar_lea.hbm %s2273_s7, 13312 }
 0x310   :  { %p1636_p13 = scmp.ne.s32.totalorder %s2273_s7, %s1635_s24  ;;  %p1639_p0 = scmp.lt.u32.totalorder %s1635_s24, %s2273_s7 }
 0x312   :  { %p1641_p1 = pnand %p1639_p0, %p1636_p13 }
 0x314   :  { %1644 = shalt.err (!%p1641_p1)
}
 0x315   :  { %1278 = dma.vmem_to_hbm [thread:$0]  %s1273_s20, 13312, %s2273_s7, [#allocation4], %s1650_s11, %s1650_s11, %s1651_s12  }
 0x316   :  { %1647 = dma.done.wait [#allocation4], 13312  }
 0x317   :  { %1648 = vsyncadd [#allocation4], 4294953984 }
 0x318   :  { %1282 = vsyncpa [#allocation3], 1 }
 0x319   :  { %1283 = vsyncpa [#allocation4], 1 }

</bundles_post_ra>
